<compile_context>
chip_gen: v5e
topology: v5e:2x2
jax: 0.10.0
libtpu: 0.0.40
codegen_flags: <defaults>
</compile_context>

<pallas_src>
import jax
import jax.numpy as jnp
from jax.experimental import pallas as pl
from jax.experimental.pallas import tpu as pltpu

EPS_IN = 1e-5     # nn.InstanceNorm2d default eps
EPS_LN = 1e-5     # nn.LayerNorm default eps
NEG_SLOPE = 0.1   # LeakyReLU slope used by the critic


def _leaky_relu(x):
    return jnp.where(x > 0, x, NEG_SLOPE * x)


def _layer_norm_t(x, gamma, beta):
    """LayerNorm over the feature axis in (C, N_pixels) layout (axis=0)."""
    mean = jnp.mean(x, axis=0, keepdims=True)
    var = jnp.mean((x - mean) ** 2, axis=0, keepdims=True)   # biased, like torch
    return (x - mean) * jax.lax.rsqrt(var + EPS_LN) * gamma + beta


# ----------------------------------------------------------------------------
# Fused per-image kernel: InstanceNorm + backbone-projection + critic decoder.
# All activations are (C, H*W): features on sublanes, pixels on lanes.
# ----------------------------------------------------------------------------
def _fused_kernel(x_ref, wf_ref, g1_ref, b1_ref,
                  w2_ref, g2_ref, b2_ref, w3_ref, b3_ref, o_ref):
    x = x_ref[0]                                              # (5, HW) fp32

    # InstanceNorm2d(5): per-channel normalization over the spatial (lane) axis.
    mean = jnp.mean(x, axis=-1, keepdims=True)
    var = jnp.mean((x - mean) ** 2, axis=-1, keepdims=True)   # biased, like torch
    xn = (x - mean) * jax.lax.rsqrt(var + EPS_IN)

    # Backbone stand-in (1x1 5->64 proj) folded into Linear(64,32): w_fused is
    # (32, 5).  TODO(synk): res_unet source not provided; revisit this fusion
    # once the real backbone (with its nonlinearities) is implemented.
    h = jnp.dot(wf_ref[...], xn, preferred_element_type=jnp.float32)   # (32, HW)
    h = _leaky_relu(_layer_norm_t(h, g1_ref[...], b1_ref[...]))
    h = jnp.dot(w2_ref[...], h, preferred_element_type=jnp.float32)    # (16, HW)
    h = _leaky_relu(_layer_norm_t(h, g2_ref[...], b2_ref[...]))
    q = jnp.dot(w3_ref[...], h, preferred_element_type=jnp.float32)    # (1, HW)
    o_ref[0] = q + b3_ref[...]                                # lane-dense store


# ----------------------------------------------------------------------------
# Wrapper: depth standardization, channel concat, weight fusion, pallas_call.
# ----------------------------------------------------------------------------
def standardize_depth(depth):
    # TODO(synk): exact `standardize_depth` source not provided; per-image
    # zero-mean / unit-std over spatial dims is used here.
    mean = jnp.mean(depth, axis=(2, 3), keepdims=True)
    std = jnp.std(depth, axis=(2, 3), keepdims=True)
    return (depth - mean) / (std + 1e-6)


def shift_policy_critic_forward(params, rgb, depth, target_mask):
    B, _, H, W = rgb.shape
    HW = H * W

    depth = standardize_depth(depth)
    # NCHW concat -> (B, 5, H*W): already the (C, pixels) layout the kernel
    # wants, so no transpose is needed anywhere.
    x = jnp.concatenate([rgb, depth, target_mask], axis=1).reshape(B, 5, HW)
    x = x.astype(jnp.float32)

    # Fold backbone stand-in into the first decoder linear and pre-transpose
    # all weights to the (out_features, in_features) layout used in-kernel.
    wf = (params["w_bb"] @ params["w1"]).T                     # (32, 5)
    w2t = params["w2"].T                                       # (16, 32)
    w3t = params["w3"].T                                       # (1, 16)
    g1 = params["g1"].reshape(32, 1)
    b1 = params["b1"].reshape(32, 1)
    g2 = params["g2"].reshape(16, 1)
    b2 = params["b2"].reshape(16, 1)
    b3 = params["b3"].reshape(1, 1)

    def full_spec(arr):
        nd = arr.ndim
        return pl.BlockSpec(arr.shape, lambda b, _nd=nd: (0,) * _nd)

    q = pl.pallas_call(
        _fused_kernel,
        out_shape=jax.ShapeDtypeStruct((B, 1, HW), jnp.float32),
        grid=(B,),
        in_specs=[
            pl.BlockSpec((1, 5, HW), lambda b: (b, 0, 0)),
            full_spec(wf),
            full_spec(g1), full_spec(b1),
            full_spec(w2t),
            full_spec(g2), full_spec(b2),
            full_spec(w3t), full_spec(b3),
        ],
        out_specs=pl.BlockSpec((1, 1, HW), lambda b: (b, 0, 0)),
        compiler_params=pltpu.CompilerParams(dimension_semantics=("parallel",)),
    )(x, wf, g1, b1, w2t, g2, b2, w3t, b3)

    return q.reshape(B, 1, H, W)


# ----------------------------------------------------------------------------
# Deterministic parameter init (shapes implied by the module's __init__).
# ----------------------------------------------------------------------------
def init_params(key):
    ks = jax.random.split(key, 5)

    def lin(k, fan_in, fan_out):
        bound = 1.0 / jnp.sqrt(jnp.float32(fan_in))
        return jax.random.uniform(k, (fan_in, fan_out), jnp.float32, -bound, bound)

    return {
        "w_bb": lin(ks[0], 5, 64),                       # backbone stand-in (1x1 proj)
        "w1":   lin(ks[1], 64, 32),                      # Linear(64,32,bias=False)
        "g1":   jnp.ones((1, 32), jnp.float32),          # LayerNorm(32) weight
        "b1":   jnp.zeros((1, 32), jnp.float32),         # LayerNorm(32) bias
        "w2":   lin(ks[2], 32, 16),                      # Linear(32,16,bias=False)
        "g2":   jnp.ones((1, 16), jnp.float32),          # LayerNorm(16) weight
        "b2":   jnp.zeros((1, 16), jnp.float32),         # LayerNorm(16) bias
        "w3":   lin(ks[3], 16, 1),                       # Linear(16,1) weight
        "b3":   jax.random.uniform(ks[4], (1, 1), jnp.float32, -0.25, 0.25),  # bias
    }


if __name__ == "__main__":
    key = jax.random.PRNGKey(0)
    k_p, k_rgb, k_d, k_m = jax.random.split(key, 4)

    B, H, W = 2, 16, 16
    rgb = jax.random.normal(k_rgb, (B, 3, H, W), jnp.float32)
    depth = jax.random.uniform(k_d, (B, 1, H, W), jnp.float32, 0.2, 1.5)
    target_mask = (jax.random.uniform(k_m, (B, 1, H, W)) > 0.5).astype(jnp.float32)

    params = init_params(k_p)
    q = shift_policy_critic_forward(params, rgb, depth, target_mask)
    q = jax.block_until_ready(q)
    assert q.shape == (B, 1, H, W) and q.dtype == jnp.float32
    assert bool(jnp.all(jnp.isfinite(q)))
    print("KERNEL_OK")
</pallas_src>

<mosaic_0001>
module attributes {stable_mosaic.version = 11 : i64} {
  func.func @_fused_kernel(%arg0: i32, %arg1: memref<1x5x256xf32, #tpu.memory_space<vmem>>, %arg2: memref<32x5xf32, #tpu.memory_space<vmem>>, %arg3: memref<32x1xf32, #tpu.memory_space<vmem>>, %arg4: memref<32x1xf32, #tpu.memory_space<vmem>>, %arg5: memref<16x32xf32, #tpu.memory_space<vmem>>, %arg6: memref<16x1xf32, #tpu.memory_space<vmem>>, %arg7: memref<16x1xf32, #tpu.memory_space<vmem>>, %arg8: memref<1x16xf32, #tpu.memory_space<vmem>>, %arg9: memref<1x1xf32, #tpu.memory_space<vmem>>, %arg10: memref<1x1x256xf32, #tpu.memory_space<vmem>>) attributes {dimension_semantics = [#tpu.dimension_semantics<parallel>], iteration_bounds = array<i64: 2>, scalar_prefetch = 0 : i64, scratch_operands = 0 : i64, tpu.core_type = #tpu.core_type<tc>, window_params = [{transform_indices = @transform_0, window_bounds = array<i64: 1, 5, 256>}, {pipeline_mode = #tpu.pipeline_mode<synchronous>, transform_indices = @transform_1, window_bounds = array<i64: 32, 5>}, {pipeline_mode = #tpu.pipeline_mode<synchronous>, transform_indices = @transform_2, window_bounds = array<i64: 32, 1>}, {pipeline_mode = #tpu.pipeline_mode<synchronous>, transform_indices = @transform_3, window_bounds = array<i64: 32, 1>}, {pipeline_mode = #tpu.pipeline_mode<synchronous>, transform_indices = @transform_4, window_bounds = array<i64: 16, 32>}, {pipeline_mode = #tpu.pipeline_mode<synchronous>, transform_indices = @transform_5, window_bounds = array<i64: 16, 1>}, {pipeline_mode = #tpu.pipeline_mode<synchronous>, transform_indices = @transform_6, window_bounds = array<i64: 16, 1>}, {pipeline_mode = #tpu.pipeline_mode<synchronous>, transform_indices = @transform_7, window_bounds = array<i64: 1, 16>}, {pipeline_mode = #tpu.pipeline_mode<synchronous>, transform_indices = @transform_8, window_bounds = array<i64: 1, 1>}, {transform_indices = @transform_9, window_bounds = array<i64: 1, 1, 256>}]} {
    %c0 = arith.constant 0 : index
    %c0_0 = arith.constant 0 : index
    %c0_1 = arith.constant 0 : index
    %0 = vector.load %arg1[%c0, %c0_0, %c0_1] : memref<1x5x256xf32, #tpu.memory_space<vmem>>, vector<1x5x256xf32>
    %1 = vector.shape_cast %0 : vector<1x5x256xf32> to vector<5x256xf32>
    %cst = arith.constant dense<0.000000e+00> : vector<5xf32>
    %2 = vector.multi_reduction <add>, %1, %cst [1] : vector<5x256xf32> to vector<5xf32>
    %3 = vector.shape_cast %2 : vector<5xf32> to vector<5x1xf32>
    %cst_2 = arith.constant 2.560000e+02 : f32
    %4 = vector.broadcast %cst_2 : f32 to vector<5x1xf32>
    %5 = arith.divf %3, %4 : vector<5x1xf32>
    %6 = vector.broadcast %5 : vector<5x1xf32> to vector<5x256xf32>
    %7 = arith.subf %1, %6 : vector<5x256xf32>
    %8 = arith.mulf %7, %7 : vector<5x256xf32>
    %cst_3 = arith.constant dense<0.000000e+00> : vector<5xf32>
    %9 = vector.multi_reduction <add>, %8, %cst_3 [1] : vector<5x256xf32> to vector<5xf32>
    %10 = vector.shape_cast %9 : vector<5xf32> to vector<5x1xf32>
    %cst_4 = arith.constant 2.560000e+02 : f32
    %11 = vector.broadcast %cst_4 : f32 to vector<5x1xf32>
    %12 = arith.divf %10, %11 : vector<5x1xf32>
    %13 = vector.broadcast %5 : vector<5x1xf32> to vector<5x256xf32>
    %14 = arith.subf %1, %13 : vector<5x256xf32>
    %cst_5 = arith.constant 9.99999974E-6 : f32
    %15 = vector.broadcast %cst_5 : f32 to vector<5x1xf32>
    %16 = arith.addf %12, %15 : vector<5x1xf32>
    %17 = math.rsqrt %16 : vector<5x1xf32>
    %18 = vector.broadcast %17 : vector<5x1xf32> to vector<5x256xf32>
    %19 = arith.mulf %14, %18 : vector<5x256xf32>
    %c0_6 = arith.constant 0 : index
    %c0_7 = arith.constant 0 : index
    %20 = vector.load %arg2[%c0_6, %c0_7] : memref<32x5xf32, #tpu.memory_space<vmem>>, vector<32x5xf32>
    %cst_8 = arith.constant dense<0.000000e+00> : vector<32x256xf32>
    %21 = tpu.matmul %20, %19, %cst_8 {dimension_numbers = #tpu.dot_dimension_numbers<[1], [0], [0], [1], [0, 0, 1, 1], [], []>} : vector<32x5xf32>, vector<5x256xf32>, vector<32x256xf32> -> vector<32x256xf32>
    %c0_9 = arith.constant 0 : index
    %c0_10 = arith.constant 0 : index
    %22 = vector.load %arg3[%c0_9, %c0_10] : memref<32x1xf32, #tpu.memory_space<vmem>>, vector<32x1xf32>
    %c0_11 = arith.constant 0 : index
    %c0_12 = arith.constant 0 : index
    %23 = vector.load %arg4[%c0_11, %c0_12] : memref<32x1xf32, #tpu.memory_space<vmem>>, vector<32x1xf32>
    %cst_13 = arith.constant dense<0.000000e+00> : vector<256xf32>
    %24 = vector.multi_reduction <add>, %21, %cst_13 [0] : vector<32x256xf32> to vector<256xf32>
    %25 = vector.shape_cast %24 : vector<256xf32> to vector<1x256xf32>
    %cst_14 = arith.constant 3.200000e+01 : f32
    %26 = vector.broadcast %cst_14 : f32 to vector<1x256xf32>
    %27 = arith.divf %25, %26 : vector<1x256xf32>
    %28 = vector.broadcast %27 : vector<1x256xf32> to vector<32x256xf32>
    %29 = arith.subf %21, %28 : vector<32x256xf32>
    %30 = arith.mulf %29, %29 : vector<32x256xf32>
    %cst_15 = arith.constant dense<0.000000e+00> : vector<256xf32>
    %31 = vector.multi_reduction <add>, %30, %cst_15 [0] : vector<32x256xf32> to vector<256xf32>
    %32 = vector.shape_cast %31 : vector<256xf32> to vector<1x256xf32>
    %cst_16 = arith.constant 3.200000e+01 : f32
    %33 = vector.broadcast %cst_16 : f32 to vector<1x256xf32>
    %34 = arith.divf %32, %33 : vector<1x256xf32>
    %35 = vector.broadcast %27 : vector<1x256xf32> to vector<32x256xf32>
    %36 = arith.subf %21, %35 : vector<32x256xf32>
    %cst_17 = arith.constant 9.99999974E-6 : f32
    %37 = vector.broadcast %cst_17 : f32 to vector<1x256xf32>
    %38 = arith.addf %34, %37 : vector<1x256xf32>
    %39 = math.rsqrt %38 : vector<1x256xf32>
    %40 = vector.broadcast %39 : vector<1x256xf32> to vector<32x256xf32>
    %41 = arith.mulf %36, %40 : vector<32x256xf32>
    %42 = vector.broadcast %22 : vector<32x1xf32> to vector<32x256xf32>
    %43 = arith.mulf %41, %42 : vector<32x256xf32>
    %44 = vector.broadcast %23 : vector<32x1xf32> to vector<32x256xf32>
    %45 = arith.addf %43, %44 : vector<32x256xf32>
    %cst_18 = arith.constant 0.000000e+00 : f32
    %46 = vector.broadcast %cst_18 : f32 to vector<32x256xf32>
    %47 = arith.cmpf ogt, %45, %46 : vector<32x256xf32>
    %cst_19 = arith.constant 1.000000e-01 : f32
    %48 = vector.broadcast %cst_19 : f32 to vector<32x256xf32>
    %49 = arith.mulf %48, %45 : vector<32x256xf32>
    %50 = arith.select %47, %45, %49 : vector<32x256xi1>, vector<32x256xf32>
    %c0_20 = arith.constant 0 : index
    %c0_21 = arith.constant 0 : index
    %51 = vector.load %arg5[%c0_20, %c0_21] : memref<16x32xf32, #tpu.memory_space<vmem>>, vector<16x32xf32>
    %cst_22 = arith.constant dense<0.000000e+00> : vector<16x256xf32>
    %52 = tpu.matmul %51, %50, %cst_22 {dimension_numbers = #tpu.dot_dimension_numbers<[1], [0], [0], [1], [0, 0, 1, 1], [], []>} : vector<16x32xf32>, vector<32x256xf32>, vector<16x256xf32> -> vector<16x256xf32>
    %c0_23 = arith.constant 0 : index
    %c0_24 = arith.constant 0 : index
    %53 = vector.load %arg6[%c0_23, %c0_24] : memref<16x1xf32, #tpu.memory_space<vmem>>, vector<16x1xf32>
    %c0_25 = arith.constant 0 : index
    %c0_26 = arith.constant 0 : index
    %54 = vector.load %arg7[%c0_25, %c0_26] : memref<16x1xf32, #tpu.memory_space<vmem>>, vector<16x1xf32>
    %cst_27 = arith.constant dense<0.000000e+00> : vector<256xf32>
    %55 = vector.multi_reduction <add>, %52, %cst_27 [0] : vector<16x256xf32> to vector<256xf32>
    %56 = vector.shape_cast %55 : vector<256xf32> to vector<1x256xf32>
    %cst_28 = arith.constant 1.600000e+01 : f32
    %57 = vector.broadcast %cst_28 : f32 to vector<1x256xf32>
    %58 = arith.divf %56, %57 : vector<1x256xf32>
    %59 = vector.broadcast %58 : vector<1x256xf32> to vector<16x256xf32>
    %60 = arith.subf %52, %59 : vector<16x256xf32>
    %61 = arith.mulf %60, %60 : vector<16x256xf32>
    %cst_29 = arith.constant dense<0.000000e+00> : vector<256xf32>
    %62 = vector.multi_reduction <add>, %61, %cst_29 [0] : vector<16x256xf32> to vector<256xf32>
    %63 = vector.shape_cast %62 : vector<256xf32> to vector<1x256xf32>
    %cst_30 = arith.constant 1.600000e+01 : f32
    %64 = vector.broadcast %cst_30 : f32 to vector<1x256xf32>
    %65 = arith.divf %63, %64 : vector<1x256xf32>
    %66 = vector.broadcast %58 : vector<1x256xf32> to vector<16x256xf32>
    %67 = arith.subf %52, %66 : vector<16x256xf32>
    %cst_31 = arith.constant 9.99999974E-6 : f32
    %68 = vector.broadcast %cst_31 : f32 to vector<1x256xf32>
    %69 = arith.addf %65, %68 : vector<1x256xf32>
    %70 = math.rsqrt %69 : vector<1x256xf32>
    %71 = vector.broadcast %70 : vector<1x256xf32> to vector<16x256xf32>
    %72 = arith.mulf %67, %71 : vector<16x256xf32>
    %73 = vector.broadcast %53 : vector<16x1xf32> to vector<16x256xf32>
    %74 = arith.mulf %72, %73 : vector<16x256xf32>
    %75 = vector.broadcast %54 : vector<16x1xf32> to vector<16x256xf32>
    %76 = arith.addf %74, %75 : vector<16x256xf32>
    %cst_32 = arith.constant 0.000000e+00 : f32
    %77 = vector.broadcast %cst_32 : f32 to vector<16x256xf32>
    %78 = arith.cmpf ogt, %76, %77 : vector<16x256xf32>
    %cst_33 = arith.constant 1.000000e-01 : f32
    %79 = vector.broadcast %cst_33 : f32 to vector<16x256xf32>
    %80 = arith.mulf %79, %76 : vector<16x256xf32>
    %81 = arith.select %78, %76, %80 : vector<16x256xi1>, vector<16x256xf32>
    %c0_34 = arith.constant 0 : index
    %c0_35 = arith.constant 0 : index
    %82 = vector.load %arg8[%c0_34, %c0_35] : memref<1x16xf32, #tpu.memory_space<vmem>>, vector<1x16xf32>
    %cst_36 = arith.constant dense<0.000000e+00> : vector<1x256xf32>
    %83 = tpu.matmul %82, %81, %cst_36 {dimension_numbers = #tpu.dot_dimension_numbers<[1], [0], [0], [1], [0, 0, 1, 1], [], []>} : vector<1x16xf32>, vector<16x256xf32>, vector<1x256xf32> -> vector<1x256xf32>
    %c0_37 = arith.constant 0 : index
    %c0_38 = arith.constant 0 : index
    %84 = vector.load %arg9[%c0_37, %c0_38] : memref<1x1xf32, #tpu.memory_space<vmem>>, vector<1x1xf32>
    %85 = vector.broadcast %84 : vector<1x1xf32> to vector<1x256xf32>
    %86 = arith.addf %83, %85 : vector<1x256xf32>
    %c0_39 = arith.constant 0 : index
    %c0_40 = arith.constant 0 : index
    %c0_41 = arith.constant 0 : index
    %87 = vector.load %arg10[%c0_39, %c0_40, %c0_41] : memref<1x1x256xf32, #tpu.memory_space<vmem>>, vector<1x1x256xf32>
    %88 = vector.shape_cast %87 : vector<1x1x256xf32> to vector<1x256xf32>
    %89 = vector.shape_cast %86 : vector<1x256xf32> to vector<1x1x256xf32>
    tpu.vector_store %arg10[%c0_39, %c0_40, %c0_41], %89 {strides = array<i32>} : memref<1x1x256xf32, #tpu.memory_space<vmem>>, vector<1x1x256xf32>,
    return
  }
  func.func @transform_0(%arg0: i32) -> (i32, i32, i32) {
    %c0_i32 = arith.constant 0 : i32
    %c0_i32_0 = arith.constant 0 : i32
    %c0_i32_1 = arith.constant 0 : i32
    return %arg0, %c0_i32, %c0_i32_0 : i32, i32, i32
  }
  func.func @transform_1(%arg0: i32) -> (i32, i32) {
    %c0_i32 = arith.constant 0 : i32
    %c0_i32_0 = arith.constant 0 : i32
    %c0_i32_1 = arith.constant 0 : i32
    return %c0_i32, %c0_i32_0 : i32, i32
  }
  func.func @transform_2(%arg0: i32) -> (i32, i32) {
    %c0_i32 = arith.constant 0 : i32
    %c0_i32_0 = arith.constant 0 : i32
    %c0_i32_1 = arith.constant 0 : i32
    return %c0_i32, %c0_i32_0 : i32, i32
  }
  func.func @transform_3(%arg0: i32) -> (i32, i32) {
    %c0_i32 = arith.constant 0 : i32
    %c0_i32_0 = arith.constant 0 : i32
    %c0_i32_1 = arith.constant 0 : i32
    return %c0_i32, %c0_i32_0 : i32, i32
  }
  func.func @transform_4(%arg0: i32) -> (i32, i32) {
    %c0_i32 = arith.constant 0 : i32
    %c0_i32_0 = arith.constant 0 : i32
    %c0_i32_1 = arith.constant 0 : i32
    return %c0_i32, %c0_i32_0 : i32, i32
  }
  func.func @transform_5(%arg0: i32) -> (i32, i32) {
    %c0_i32 = arith.constant 0 : i32
    %c0_i32_0 = arith.constant 0 : i32
    %c0_i32_1 = arith.constant 0 : i32
    return %c0_i32, %c0_i32_0 : i32, i32
  }
  func.func @transform_6(%arg0: i32) -> (i32, i32) {
    %c0_i32 = arith.constant 0 : i32
    %c0_i32_0 = arith.constant 0 : i32
    %c0_i32_1 = arith.constant 0 : i32
    return %c0_i32, %c0_i32_0 : i32, i32
  }
  func.func @transform_7(%arg0: i32) -> (i32, i32) {
    %c0_i32 = arith.constant 0 : i32
    %c0_i32_0 = arith.constant 0 : i32
    %c0_i32_1 = arith.constant 0 : i32
    return %c0_i32, %c0_i32_0 : i32, i32
  }
  func.func @transform_8(%arg0: i32) -> (i32, i32) {
    %c0_i32 = arith.constant 0 : i32
    %c0_i32_0 = arith.constant 0 : i32
    %c0_i32_1 = arith.constant 0 : i32
    return %c0_i32, %c0_i32_0 : i32, i32
  }
  func.func @transform_9(%arg0: i32) -> (i32, i32, i32) {
    %c0_i32 = arith.constant 0 : i32
    %c0_i32_0 = arith.constant 0 : i32
    %c0_i32_1 = arith.constant 0 : i32
    return %arg0, %c0_i32, %c0_i32_0 : i32, i32, i32
  }
}

</mosaic_0001>

<bundles_post_ra>
// kernel: tpu_custom_call.1
= control target key start
LH: loop header
LB: loop body
LE: loop exit
PB: predicated region body
PF: predicated region fallthrough
CT: control target
= control target key end

     0   :  { %s1341_s0 = inlined_call_operand.vmem [shape: f32[2,5,256], index: 0, kind: input, shape index: {}]   ;;  %s1342_s1 = inlined_call_operand.vmem [shape: f32[32,5], index: 1, kind: input, shape index: {}]   ;;  %s1343_s2 = inlined_call_operand.vmem [shape: f32[32,1], index: 2, kind: input, shape index: {}]   ;;  %s1344_s3 = inlined_call_operand.vmem [shape: f32[32,1], index: 3, kind: input, shape index: {}]   ;;  %s1345_s4 = inlined_call_operand.vmem [shape: f32[16,32], index: 4, kind: input, shape index: {}]   ;;  %s1346_s5 = inlined_call_operand.vmem [shape: f32[16,1], index: 5, kind: input, shape index: {}]   ;;  %s1347_s6 = inlined_call_operand.vmem [shape: f32[16,1], index: 6, kind: input, shape index: {}]   ;;  %s1348_s7 = inlined_call_operand.vmem [shape: f32[1,16], index: 7, kind: input, shape index: {}]   ;;  %s1349_s8 = inlined_call_operand.<no memory space> [shape: f32[1,1], index: 8, kind: input, shape index: {}]   ;;  %s1350_s9 = inlined_call_operand.hbm [shape: f32[2,1,256], index: 9, kind: output, shape index: {}]  }
   0x1   :  { %v14_v0 = vstv %s1349_s8 }
   0x2   :  { %15 = vst [vmem:[#allocation2] sm:$0x1] %v14_v0 }
   0x3   :  { %16 = vsyncpa [#allocation4], 0 }
   0x4   :  { %18 = vsyncpa [#allocation4 + $0x1], 0  ;;  %s1155_s11 = smov 0   ;;  %s1157_s12 = smov 0  }
   0x5   :  { %s1159_s13 = smov 0   ;;  %s1161_s14 = smov 0  }
   0x6 LB: > { %s1176_s8 = sadd.s32 4294967295, %s1096_s14   ;;  %s944_s15 = sadd.s32 4294967294, %s1096_s14   ;;  %s1096_s14 = sphi %s1161_s14, %s1356_s14   ;;  %s1092_s13 = sphi %s1159_s13, %s1355_s13   ;;  %s1088_s12 = sphi %s1157_s12, %s1354_s12   ;;  %s1084_s11 = sphi %s1155_s11, %s1353_s11  }
   0x7   : > { %s1180_s16 = sadd.s32 1, %s1096_s14   ;;  %s225_s17 = sadd.s32 1, %s1092_s13 }
   0x8   : > { %s222_s18 = ssub.s32 %s1096_s14, %s1180_s16  ;;  %p235_p0 = scmp.ne.s32.totalorder %s1092_s13, %s1088_s12 }
   0x9   : > { %p223_p1 = scmp.eq.s32.totalorder %s222_s18, 0  ;;  %p236_p2 = scmp.eq.s32.totalorder %s1176_s8, 1 }
   0xa   : > { %p241_p3 = scmp.ne.s32.totalorder %s1088_s12, %s1084_s11  ;;  %p242_p4 = scmp.eq.s32.totalorder %s944_s15, 1 }
   0xb   : > { %s1191_s19 = scalar_select %p223_p1, %s1092_s13, %s225_s17  }
   0xc   : > { %p1193_p5 = por %p236_p2, %p235_p0  ;;  %p1197_p6 = por %p242_p4, %p241_p3 }
   0xd   : > { %p947_p7 = scmp.ge.s32.totalorder %s1096_s14, 1  ;;  %p292_p8 = scmp.lt.s32.totalorder %s1096_s14, 3 }
   0xf   : > { %p293_p9 = pnand %p947_p7, %p292_p8 }
  0x10   : > { %p328_p10 = scmp.lt.s32.totalorder (!%p293_p9), %s1176_s8, 1  ;;  %s968_s28 = sshll.u32 (!%p293_p9), %s1176_s8, 1 }
  0x11   : > { %296 = sbr.rel (%p293_p9) target bundleno = 871 (0x367), region = 56  ;;  %s880_s10 = scalar_lea.hbm (!%p293_p9), %s1350_s9, %s968_s28 }
  0x12   : > { %s884_s18 = sshll.u32 (!%p293_p9), %s880_s10, 4  ;;  %s885_s18 = int_to_ptr.hbm [resolvable:$true] %s884_s18 }
  0x16   : > { %s329_s22 = scalar_select %p328_p10, %s1176_s8, 1  ;;  %vm335_vm0 = vcmask 1044480   ;;  %v1098_v6 = vmov 256.0   ;;  %v456_v30 = vld [vmem:[%s1343_s2 + $0x18] sm:$0xff]  ;;  %v1099_v31 = vmov 0   ;;  %v372_v37 = vld [vmem:[%s1342_s1] sm:$0xff] }
  0x17   : > { %1018 = vrcp.f32 %v1098_v6  ;;  %1015 = vset.pattern.permute.xlu1 %v1099_v31  ;;  %1016 = vset.pattern.permute.xlu2 %v1099_v31  ;;  %v460_v32 = vld [vmem:[%s1344_s3 + $0x18] sm:$0xff]  ;;  %vm376_vm5 = vcmask 39936   ;;  %v455_v38 = vld [vmem:[%s1343_s2 + $0x10] sm:$0xff]  ;;  %v454_v39 = vld [vmem:[%s1343_s2 + $0x8] sm:$0xff]  ;;  %v1100_v56 = vmov 32.0  }
  0x18   : > { %s971_s23 = sshll.u32 %s329_s22, 4  ;;  %571 = vperm.xlu1 %1015, %v456_v30   ;;  %599 = vperm.xlu2 %1016, %v460_v32   ;;  %v459_v40 = vld [vmem:[%s1344_s3 + $0x10] sm:$0xff]  ;;  %v373_v41 = vld [vmem:[%s1342_s1 + $0x8] sm:$0xff]  ;;  %v453_v42 = vld [vmem:[%s1343_s2] sm:$0xff]  ;;  %s1048_s22 = sshra.s32 %s885_s18, 4  ;;  %s1049_s22 = int_to_ptr.hbm [resolvable:$true] %s1048_s22 }
  0x19   : > { %s332_s26 = scalar_lea.vmem %s1341_s0, %s971_s23  ;;  %1017 = vset.pattern.permute.xlu0 %v1099_v31  ;;  %v458_v43 = vld [vmem:[%s1344_s3 + $0x8] sm:$0xff]  ;;  %v374_v44 = vld [vmem:[%s1342_s1 + $0x10] sm:$0xff]  ;;  %v457_v45 = vld [vmem:[%s1344_s3] sm:$0xff]  ;;  %s1050_s23 = scalar_lea.hbm %s1049_s22, 2 }
  0x1a   : > { %v333_v1 = vld [vmem:[%s332_s26] sm:$0x1f]  ;;  %v334_v2 = vld [vmem:[%s332_s26 + $0x8] sm:$0x1f]  ;;  %v375_v47 = vld [vmem:[%s1342_s1 + $0x18] sm:$0xff]  ;;  %s325_s26 = sand.u32 1, %s1088_s12   ;;  %p1051_p11 = scmp.ne.s32.totalorder %s1049_s22, %s1050_s23 }
  0x1b   : > { %v336_v3 = vsel %vm335_vm0, %v333_v1, 0.0  ;;  %v337_v4 = vsel %vm335_vm0, %v334_v2, 0.0  ;;  %v690_v46 = vld [vmem:[%s1346_s5 + $0x8] sm:$0xff]  ;;  %v689_v48 = vld [vmem:[%s1346_s5] sm:$0xff]  ;;  %s948_s27 = sshll.u32 %s325_s26, 1  ;;  %s870_s8 = scalar_lea.sflag [#allocation4], %s325_s26 }
  0x1c   : > { %v338_v5 = vadd.f32 %v337_v4, %v336_v3  ;;  %v692_v49 = vld [vmem:[%s1347_s6 + $0x8] sm:$0xff]  ;;  %v691_v50 = vld [vmem:[%s1347_s6] sm:$0xff]  ;;  %s327_s15 = scalar_lea.vmem [#allocation3], %s948_s27  ;;  %p1052_p12 = pnand %p1051_p11, %p1193_p5 }
  0x1d   : > { %v1019_v7 = vpop.eup %1018  ;;  %v807_v51 = vld [vmem:[#allocation2] sm:$0x1]  ;;  %s882_s17 = sshll.u32 %s327_s15, 4  ;;  %s1054_s27 = scalar_lea.hbm %s1350_s9, 4  ;;  %s883_s17 = int_to_ptr.vmem [resolvable:$true] %s882_s17 }
  0x1e   : > { %339 = vadd.xlane.f32.xlu0 %v338_v5  ;;  %v342_v8 = vmul.f32 256.0, %v1019_v7  ;;  %vm346_vm1 = vweird.f32 %v1019_v7  ;;  %p1053_p13 = pneg %p1052_p12  ;;  %p1055_p0 = scmp.lt.s32.totalorder %s1049_s22, %s1350_s9 }
  0x1f   : > { %p1056_p1 = scmp.lt.s32.totalorder %s1054_s27, %s1050_s23 }
  0x20   : > { %v343_v9 = vsub.f32 1.0, %v342_v8  ;;  %566 = vperm.xlu1 %1015, %v455_v38   ;;  %561 = vperm.xlu2 %1016, %v454_v39  }
  0x21   : > { %p1057_p2 = por %p1056_p1, %p1055_p0 }
  0x22   : > { %v344_v10 = vmul.f32 %v1019_v7, %v343_v9 }
  0x23   : > { %p1058_p3 = pnand %p1057_p2, %p1053_p13 }
  0x24   : > { %v345_v11 = vadd.f32 %v1019_v7, %v344_v10 }
  0x26   : > { %v347_v12 = vsel %vm346_vm1, %v1019_v7, %v345_v11 }
  0x28   : > { %556 = vperm.xlu1 %1015, %v453_v42   ;;  %589 = vperm.xlu2 %1016, %v458_v43  }
  0x30   : > { %584 = vperm.xlu1 %1015, %v457_v45   ;;  %773 = vperm.xlu2 %1016, %v690_v46  }
  0x38   : > { %768 = vperm.xlu1 %1015, %v689_v48   ;;  %787 = vperm.xlu2 %1016, %v692_v49  }
  0x40   : > { %782 = vperm.xlu1 %1015, %v691_v50   ;;  %810 = vperm.xlu2 %1016, %v807_v51  }
  0x91   : > { %v340_v13 = vpop.xlane.xlu0 %339 }
  0x92   : > { %v348_v14 = vmul.f32 %v347_v12, %v340_v13 }
  0x94   : > { %v349_v15 = vsub.f32 %v333_v1, %v348_v14  ;;  %v350_v16 = vsub.f32 %v334_v2, %v348_v14 }
  0x96   : > { %v351_v17 = vmul.f32 %v349_v15, %v349_v15  ;;  %v352_v18 = vmul.f32 %v350_v16, %v350_v16 }
  0x98   : > { %v353_v19 = vsel %vm335_vm0, %v351_v17, 0.0  ;;  %v354_v20 = vsel %vm335_vm0, %v352_v18, 0.0 }
  0x99   : > { %v355_v21 = vadd.f32 %v354_v20, %v353_v19 }
  0x9b   : > { %356 = vadd.xlane.f32.xlu0 %v355_v21 }
  0xaf   : > { %594 = vperm.xlu0 %1017, %v459_v40  }
 0x10e   : > { %v357_v22 = vpop.xlane.xlu0 %356 }
 0x10f   : > { %v358_v23 = vmul.f32 %v357_v22, %v347_v12 }
 0x111   : > { %v359_v24 = vadd.f32 1e-05, %v358_v23 }
 0x113   : > { %1020 = vrsqrt.f32 %v359_v24  ;;  %vm366_vm3 = vweird.f32 %v359_v24 }
 0x114   : > { %1022 = vrcp.f32 %v1100_v56 }
 0x119   : > { %v1021_v25 = vpop.eup %1020 }
 0x11a   : > { %v361_v26 = vmul.f32 %v1021_v25, %v359_v24  ;;  %vm367_vm2 = vweird.f32 %v1021_v25  ;;  %v1023_v59 = vpop.eup %1022 }
 0x11b   : > { %vm368_vm4 = vmor %vm366_vm3, %vm367_vm2  ;;  %v480_v60 = vmul.f32 32.0, %v1023_v59  ;;  %vm484_vm6 = vweird.f32 %v1023_v59 }
 0x11c   : > { %v362_v27 = vmul.f32 %v1021_v25, %v361_v26 }
 0x11d   : > { %v481_v2 = vsub.f32 1.0, %v480_v60 }
 0x11e   : > { %v363_v28 = vmul.f32 0.5, %v362_v27 }
 0x11f   : > { %v482_v8 = vmul.f32 %v1023_v59, %v481_v2 }
 0x120   : > { %v364_v29 = vsub.f32 1.5, %v363_v28 }
 0x121   : > { %v483_v13 = vadd.f32 %v1023_v59, %v482_v8 }
 0x122   : > { %v365_v33 = vmul.f32 %v1021_v25, %v364_v29 }
 0x123   : > { %v485_v18 = vsel %vm484_vm6, %v1023_v59, %v483_v13 }
 0x124   : > { %v369_v34 = vsel %vm368_vm4, %v1021_v25, %v365_v33 }
 0x125   : > { %v370_v35 = vmul.f32 %v369_v34, %v349_v15  ;;  %v371_v36 = vmul.f32 %v369_v34, %v350_v16 }
 0x127   : > { %951 = vmatpush.msk.msra.mxu0 %vm335_vm0, %v370_v35  ;;  %956 = vmatpush.msk.msra.mxu1 %vm335_vm0, %v371_v36 }
 0x128   : > { %952 = vmatmul.msk.f32.vlgmr.msra.gmra.mxu0 %vm376_vm5, %v372_v37  ;;  %957 = vmatmul.msk.f32.vlgmr.msra.gmra.mxu1 %vm376_vm5, %v372_v37 }
 0x130   : > { %953 = vmatmul.msk.f32.gmra.mxu0 %vm376_vm5, %v373_v41  ;;  %958 = vmatmul.msk.f32.gmra.mxu1 %vm376_vm5, %v373_v41 }
 0x138   : > { %954 = vmatmul.msk.f32.gmra.mxu0 %vm376_vm5, %v374_v44  ;;  %959 = vmatmul.msk.f32.gmra.mxu1 %vm376_vm5, %v374_v44 }
 0x140   : > { %955 = vmatmul.msk.f32.gmra.mxu0 %vm376_vm5, %v375_v47  ;;  %960 = vmatmul.msk.f32.gmra.mxu1 %vm376_vm5, %v375_v47  ;;  %vm636_vm5 = vcmask 261120  }
 0x1a5   : > { %v412_v52 = vpop.f32.mrf.mxu0  ;;  %v441_v53 = vpop.f32.mrf.mxu1 }
 0x1ad   : > { %v415_v54 = vpop.f32.mrf.mxu0  ;;  %v444_v55 = vpop.f32.mrf.mxu1 }
 0x1ae   : > { %v461_v61 = vadd.f32 %v415_v54, %v412_v52  ;;  %v470_v62 = vadd.f32 %v444_v55, %v441_v53 }
 0x1b5   : > { %v418_v57 = vpop.f32.mrf.mxu0  ;;  %v447_v58 = vpop.f32.mrf.mxu1 }
 0x1b6   : > { %v462_v63 = vadd.f32 %v461_v61, %v418_v57  ;;  %v471_v0 = vadd.f32 %v470_v62, %v447_v58  ;;  %v600_v62 = vpop.permute.xlu2 %599 }
 0x1bd   : > { %v421_v1 = vpop.f32.mrf.mxu0  ;;  %v450_v3 = vpop.f32.mrf.mxu1 }
 0x1be   : > { %v463_v4 = vadd.f32 %v462_v63, %v421_v1  ;;  %v472_v5 = vadd.f32 %v471_v0, %v450_v3 }
 0x1c0   : > { %v464_v6 = vrot.slane %v463_v4, 4  ;;  %v473_v7 = vrot.slane %v472_v5, 4 }
 0x1c2   : > { %v465_v9 = vadd.f32 %v464_v6, %v463_v4  ;;  %v474_v10 = vadd.f32 %v473_v7, %v472_v5  ;;  %v562_v7 = vpop.permute.xlu2 %561 }
 0x1c4   : > { %v466_v11 = vrot.slane %v465_v9, 2  ;;  %v475_v12 = vrot.slane %v474_v10, 2 }
 0x1c6   : > { %v467_v14 = vadd.f32 %v466_v11, %v465_v9  ;;  %v476_v15 = vadd.f32 %v475_v12, %v474_v10 }
 0x1c8   : > { %v468_v16 = vrot.slane %v467_v14, 1  ;;  %v477_v17 = vrot.slane %v476_v15, 1 }
 0x1ca   : > { %v469_v19 = vadd.f32 %v468_v16, %v467_v14  ;;  %v478_v20 = vadd.f32 %v477_v17, %v476_v15 }
 0x1cc   : > { %v486_v21 = vmul.f32 %v485_v18, %v469_v19  ;;  %v487_v22 = vmul.f32 %v485_v18, %v478_v20 }
 0x1ce   : > { %v1270_v23 = vsub.f32 %v412_v52, %v486_v21  ;;  %v1272_v24 = vsub.f32 %v415_v54, %v486_v21  ;;  %v1274_v25 = vsub.f32 %v418_v57, %v486_v21  ;;  %v1276_v26 = vsub.f32 %v441_v53, %v487_v22 }
 0x1cf   : > { %v1278_v27 = vsub.f32 %v444_v55, %v487_v22  ;;  %v1280_v28 = vsub.f32 %v447_v58, %v487_v22  ;;  %v494_v29 = vsub.f32 %v421_v1, %v486_v21  ;;  %v495_v32 = vsub.f32 %v450_v3, %v487_v22  ;;  %v572_v55 = vpop.permute.xlu1 %571 }
 0x1d0   : > { %v496_v30 = vmul.f32 %v1270_v23, %v1270_v23  ;;  %v498_v31 = vmul.f32 %v1272_v24, %v1272_v24  ;;  %v497_v33 = vmul.f32 %v1276_v26, %v1276_v26  ;;  %v500_v35 = vmul.f32 %v1274_v25, %v1274_v25 }
 0x1d1   : > { %v499_v34 = vmul.f32 %v1278_v27, %v1278_v27  ;;  %v501_v37 = vmul.f32 %v1280_v28, %v1280_v28  ;;  %v502_v39 = vmul.f32 %v494_v29, %v494_v29  ;;  %v503_v41 = vmul.f32 %v495_v32, %v495_v32 }
 0x1d2   : > { %v504_v36 = vadd.f32 %v498_v31, %v496_v30  ;;  %v595_v30 = vpop.permute.xlu0 %594 }
 0x1d3   : > { %v513_v38 = vadd.f32 %v499_v34, %v497_v33 }
 0x1d4   : > { %v505_v40 = vadd.f32 %v504_v36, %v500_v35 }
 0x1d5   : > { %v514_v42 = vadd.f32 %v513_v38, %v501_v37 }
 0x1d6   : > { %v506_v43 = vadd.f32 %v505_v40, %v502_v39 }
 0x1d7   : > { %v515_v44 = vadd.f32 %v514_v42, %v503_v41  ;;  %v567_v63 = vpop.permute.xlu1 %566 }
 0x1d8   : > { %v507_v45 = vrot.slane %v506_v43, 4 }
 0x1d9   : > { %v516_v46 = vrot.slane %v515_v44, 4 }
 0x1da   : > { %v508_v47 = vadd.f32 %v507_v45, %v506_v43 }
 0x1db   : > { %v517_v48 = vadd.f32 %v516_v46, %v515_v44 }
 0x1dc   : > { %v509_v49 = vrot.slane %v508_v47, 2 }
 0x1dd   : > { %v518_v50 = vrot.slane %v517_v48, 2 }
 0x1de   : > { %v510_v51 = vadd.f32 %v509_v49, %v508_v47 }
 0x1df   : > { %v519_v52 = vadd.f32 %v518_v50, %v517_v48  ;;  %v557_v10 = vpop.permute.xlu1 %556 }
 0x1e0   : > { %v511_v53 = vrot.slane %v510_v51, 1 }
 0x1e1   : > { %v520_v54 = vrot.slane %v519_v52, 1 }
 0x1e2   : > { %v512_v56 = vadd.f32 %v511_v53, %v510_v51 }
 0x1e3   : > { %v521_v57 = vadd.f32 %v520_v54, %v519_v52 }
 0x1e4   : > { %v522_v58 = vmul.f32 %v512_v56, %v485_v18 }
 0x1e5   : > { %v523_v59 = vmul.f32 %v521_v57, %v485_v18  ;;  %v634_v57 = vld [vmem:[%s1345_s4] sm:$0xff] }
 0x1e6   : > { %v524_v60 = vadd.f32 1e-05, %v522_v58 }
 0x1e7   : > { %v525_v61 = vadd.f32 1e-05, %v523_v59 }
 0x1e8   : > { %1024 = vrsqrt.f32 %v524_v60  ;;  %vm532_vm9 = vweird.f32 %v524_v60 }
 0x1e9   : > { %1026 = vrsqrt.f32 %v525_v61  ;;  %vm542_vm11 = vweird.f32 %v525_v61 }
 0x1ee   : > { %v1025_v0 = vpop.eup %1024 }
 0x1ef   : > { %v1027_v1 = vpop.eup %1026  ;;  %v527_v2 = vmul.f32 %v1025_v0, %v524_v60  ;;  %vm533_vm7 = vweird.f32 %v1025_v0  ;;  %v635_v60 = vld [vmem:[%s1345_s4 + $0x8] sm:$0xff] }
 0x1f0   : > { %v537_v3 = vmul.f32 %v1027_v1, %v525_v61  ;;  %vm543_vm8 = vweird.f32 %v1027_v1  ;;  %vm534_vm10 = vmor %vm532_vm9, %vm533_vm7  ;;  %v1101_v61 = vmov 16.0  }
 0x1f1   : > { %v528_v4 = vmul.f32 %v1025_v0, %v527_v2  ;;  %vm544_vm12 = vmor %vm542_vm11, %vm543_vm8  ;;  %1028 = vrcp.f32 %v1101_v61 }
 0x1f2   : > { %v538_v5 = vmul.f32 %v1027_v1, %v537_v3 }
 0x1f3   : > { %v529_v6 = vmul.f32 0.5, %v528_v4 }
 0x1f4   : > { %v539_v8 = vmul.f32 0.5, %v538_v5 }
 0x1f5   : > { %v530_v9 = vsub.f32 1.5, %v529_v6 }
 0x1f6   : > { %v540_v11 = vsub.f32 1.5, %v539_v8 }
 0x1f7   : > { %v531_v12 = vmul.f32 %v1025_v0, %v530_v9 }
 0x1f8   : > { %v541_v13 = vmul.f32 %v1027_v1, %v540_v11 }
 0x1f9   : > { %v535_v14 = vsel %vm534_vm10, %v1025_v0, %v531_v12 }
 0x1fa   : > { %v552_v15 = vmul.f32 %v535_v14, %v494_v29  ;;  %v545_v16 = vsel %vm544_vm12, %v1027_v1, %v541_v13  ;;  %v550_v17 = vmul.f32 %v535_v14, %v1274_v25  ;;  %v548_v18 = vmul.f32 %v535_v14, %v1272_v24  ;;  %v590_v25 = vpop.permute.xlu2 %589 }
 0x1fb   : > { %v553_v19 = vmul.f32 %v545_v16, %v495_v32  ;;  %v551_v20 = vmul.f32 %v545_v16, %v1280_v28  ;;  %v549_v21 = vmul.f32 %v545_v16, %v1278_v27  ;;  %v546_v22 = vmul.f32 %v535_v14, %v1270_v23  ;;  %v585_v27 = vpop.permute.xlu1 %584 }
 0x1fc   : > { %v580_v31 = vmul.f32 %v572_v55, %v552_v15  ;;  %v578_v33 = vmul.f32 %v567_v63, %v550_v17  ;;  %v576_v34 = vmul.f32 %v562_v7, %v548_v18  ;;  %v547_v35 = vmul.f32 %v545_v16, %v1276_v26 }
 0x1fd   : > { %v581_v36 = vmul.f32 %v572_v55, %v553_v19  ;;  %v579_v29 = vmul.f32 %v567_v63, %v551_v20  ;;  %v577_v37 = vmul.f32 %v562_v7, %v549_v21  ;;  %v574_v38 = vmul.f32 %v557_v10, %v546_v22  ;;  %v1029_v63 = vpop.eup %1028 }
 0x1fe   : > { %v608_v39 = vadd.f32 %v600_v62, %v580_v31  ;;  %v575_v24 = vmul.f32 %v557_v10, %v547_v35  ;;  %v604_v32 = vadd.f32 %v590_v25, %v576_v34  ;;  %v606_v40 = vadd.f32 %v595_v30, %v578_v33 }
 0x1ff   : > { %v609_v28 = vadd.f32 %v600_v62, %v581_v36  ;;  %v605_v41 = vadd.f32 %v590_v25, %v577_v37  ;;  %v607_v42 = vadd.f32 %v595_v30, %v579_v29  ;;  %v602_v23 = vadd.f32 %v585_v27, %v574_v38 }
 0x200   : > { %v603_v43 = vadd.f32 %v585_v27, %v575_v24  ;;  %vm616_vm13 = vcmp.gt.f32.partialorder %v608_v39, 0.0  ;;  %v624_v44 = vmul.f32 0.1, %v608_v39  ;;  %vm614_vm15 = vcmp.gt.f32.partialorder %v606_v40, 0.0 }
 0x201   : > { %vm617_vm14 = vcmp.gt.f32.partialorder %v609_v28, 0.0  ;;  %v625_v45 = vmul.f32 0.1, %v609_v28  ;;  %v622_v26 = vmul.f32 0.1, %v606_v40  ;;  %vm615_vm0 = vcmp.gt.f32.partialorder %v607_v42, 0.0 }
 0x202   : > { %v632_v46 = vsel %vm616_vm13, %v608_v39, %v624_v44  ;;  %v623_v47 = vmul.f32 0.1, %v607_v42  ;;  %v620_v48 = vmul.f32 0.1, %v604_v32  ;;  %vm612_vm1 = vcmp.gt.f32.partialorder %v604_v32, 0.0 }
 0x203   : > { %655 = vmatpush.msra.mxu2 %v632_v46  ;;  %v633_v49 = vsel %vm617_vm14, %v609_v28, %v625_v45  ;;  %v621_v50 = vmul.f32 0.1, %v605_v41  ;;  %v630_v51 = vsel %vm614_vm15, %v606_v40, %v622_v26  ;;  %vm613_vm2 = vcmp.gt.f32.partialorder %v605_v41, 0.0 }
 0x204   : > { %678 = vmatpush.msra.mxu3 %v633_v49  ;;  %v618_v52 = vmul.f32 0.1, %v602_v23  ;;  %v631_v53 = vsel %vm615_vm0, %v607_v42, %v623_v47  ;;  %vm610_vm3 = vcmp.gt.f32.partialorder %v602_v23, 0.0  ;;  %v619_v54 = vmul.f32 0.1, %v603_v43 }
 0x205   : > { %656 = vmatpush.msra.mxu2 %v630_v51  ;;  %v628_v55 = vsel %vm612_vm1, %v604_v32, %v620_v48  ;;  %vm611_vm4 = vcmp.gt.f32.partialorder %v603_v43, 0.0  ;;  %v629_v56 = vsel %vm613_vm2, %v605_v41, %v621_v50  ;;  %v708_v1 = vmul.f32 16.0, %v1029_v63 }
 0x206   : > { %679 = vmatpush.msra.mxu3 %v631_v53  ;;  %v626_v58 = vsel %vm610_vm3, %v602_v23, %v618_v52  ;;  %v627_v59 = vsel %vm611_vm4, %v603_v43, %v619_v54  ;;  %vm712_vm6 = vweird.f32 %v1029_v63  ;;  %vm814_vm1 = vcmask 130048  }
 0x207   : > { %657 = vmatpush.msra.mxu2 %v628_v55  ;;  %v709_v3 = vsub.f32 1.0, %v708_v1  ;;  %vm861_vm2 = vcmask 1040384  }
 0x208   : > { %680 = vmatpush.msra.mxu3 %v629_v56  ;;  %v774_v56 = vpop.permute.xlu2 %773 }
 0x209   : > { %658 = vmatpush.msra.mxu2 %v626_v58  ;;  %v710_v8 = vmul.f32 %v1029_v63, %v709_v3 }
 0x20a   : > { %681 = vmatpush.msra.mxu3 %v627_v59  ;;  %961 = vmatmul.msk.f32.vlgmr.msra.gmra.mxu2 %vm636_vm5, %v634_v57 }
 0x20b   : > { %963 = vmatmul.msk.f32.vlgmr.msra.gmra.mxu3 %vm636_vm5, %v634_v57  ;;  %v711_v13 = vadd.f32 %v1029_v63, %v710_v8  ;;  %v769_v57 = vpop.permute.xlu1 %768 }
 0x20d   : > { %v713_v18 = vsel %vm712_vm6, %v1029_v63, %v711_v13 }
 0x210   : > { %v788_v8 = vpop.permute.xlu2 %787 }
 0x212   : > { %962 = vmatmul.msk.f32.gmra.mxu2 %vm636_vm5, %v635_v60 }
 0x213   : > { %964 = vmatmul.msk.f32.gmra.mxu3 %vm636_vm5, %v635_v60 }
 0x28d   : > { %v660_v62 = vpop.f32.mrf.mxu2 }
 0x28e   : > { %v683_v0 = vpop.f32.mrf.mxu3 }
 0x295   : > { %v663_v2 = vpop.f32.mrf.mxu2 }
 0x296   : > { %v693_v4 = vadd.f32 %v663_v2, %v660_v62  ;;  %v686_v5 = vpop.f32.mrf.mxu3 }
 0x297   : > { %v700_v6 = vadd.f32 %v686_v5, %v683_v0 }
 0x298   : > { %v694_v7 = vrot.slane %v693_v4, 4 }
 0x299   : > { %v701_v9 = vrot.slane %v700_v6, 4 }
 0x29a   : > { %v695_v10 = vadd.f32 %v694_v7, %v693_v4 }
 0x29b   : > { %v702_v11 = vadd.f32 %v701_v9, %v700_v6  ;;  %v783_v9 = vpop.permute.xlu1 %782 }
 0x29c   : > { %v696_v12 = vrot.slane %v695_v10, 2 }
 0x29d   : > { %v703_v14 = vrot.slane %v702_v11, 2 }
 0x29e   : > { %v697_v15 = vadd.f32 %v696_v12, %v695_v10 }
 0x29f   : > { %v704_v16 = vadd.f32 %v703_v14, %v702_v11 }
 0x2a0   : > { %v698_v17 = vrot.slane %v697_v15, 1 }
 0x2a1   : > { %v705_v19 = vrot.slane %v704_v16, 1 }
 0x2a2   : > { %v699_v20 = vadd.f32 %v698_v17, %v697_v15 }
 0x2a3   : > { %v706_v21 = vadd.f32 %v705_v19, %v704_v16 }
 0x2a4   : > { %v714_v22 = vmul.f32 %v713_v18, %v699_v20 }
 0x2a5   : > { %v715_v30 = vmul.f32 %v713_v18, %v706_v21 }
 0x2a6   : > { %v716_v31 = vsub.f32 %v660_v62, %v714_v22  ;;  %v718_v33 = vsub.f32 %v663_v2, %v714_v22  ;;  %v806_v22 = vld [vmem:[%s1348_s7] sm:$0x1] }
 0x2a7   : > { %v717_v34 = vsub.f32 %v683_v0, %v715_v30  ;;  %v719_v35 = vsub.f32 %v686_v5, %v715_v30 }
 0x2a8   : > { %v720_v36 = vmul.f32 %v716_v31, %v716_v31  ;;  %v722_v29 = vmul.f32 %v718_v33, %v718_v33 }
 0x2a9   : > { %v721_v37 = vmul.f32 %v717_v34, %v717_v34  ;;  %v723_v38 = vmul.f32 %v719_v35, %v719_v35 }
 0x2aa   : > { %v724_v25 = vadd.f32 %v722_v29, %v720_v36 }
 0x2ab   : > { %v731_v39 = vadd.f32 %v723_v38, %v721_v37 }
 0x2ac   : > { %v725_v24 = vrot.slane %v724_v25, 4 }
 0x2ad   : > { %v732_v32 = vrot.slane %v731_v39, 4 }
 0x2ae   : > { %v726_v40 = vadd.f32 %v725_v24, %v724_v25 }
 0x2af   : > { %v733_v28 = vadd.f32 %v732_v32, %v731_v39 }
 0x2b0   : > { %v727_v41 = vrot.slane %v726_v40, 2 }
 0x2b1   : > { %v734_v27 = vrot.slane %v733_v28, 2 }
 0x2b2   : > { %v728_v42 = vadd.f32 %v727_v41, %v726_v40 }
 0x2b3   : > { %v735_v23 = vadd.f32 %v734_v27, %v733_v28 }
 0x2b4   : > { %v729_v43 = vrot.slane %v728_v42, 1 }
 0x2b5   : > { %v736_v44 = vrot.slane %v735_v23, 1 }
 0x2b6   : > { %v730_v45 = vadd.f32 %v729_v43, %v728_v42 }
 0x2b7   : > { %v737_v26 = vadd.f32 %v736_v44, %v735_v23 }
 0x2b8   : > { %v738_v46 = vmul.f32 %v730_v45, %v713_v18 }
 0x2b9   : > { %v739_v47 = vmul.f32 %v737_v26, %v713_v18 }
 0x2ba   : > { %v740_v48 = vadd.f32 1e-05, %v738_v46 }
 0x2bb   : > { %v741_v49 = vadd.f32 1e-05, %v739_v47 }
 0x2bc   : > { %1030 = vrsqrt.f32 %v740_v48  ;;  %vm748_vm9 = vweird.f32 %v740_v48 }
 0x2bd   : > { %1032 = vrsqrt.f32 %v741_v49  ;;  %vm758_vm11 = vweird.f32 %v741_v49 }
 0x2c2   : > { %v1031_v50 = vpop.eup %1030 }
 0x2c3   : > { %v1033_v51 = vpop.eup %1032  ;;  %v743_v52 = vmul.f32 %v1031_v50, %v740_v48  ;;  %vm749_vm7 = vweird.f32 %v1031_v50 }
 0x2c4   : > { %v753_v53 = vmul.f32 %v1033_v51, %v741_v49  ;;  %vm759_vm8 = vweird.f32 %v1033_v51  ;;  %vm750_vm10 = vmor %vm748_vm9, %vm749_vm7 }
 0x2c5   : > { %v744_v54 = vmul.f32 %v1031_v50, %v743_v52  ;;  %vm760_vm12 = vmor %vm758_vm11, %vm759_vm8 }
 0x2c6   : > { %v754_v55 = vmul.f32 %v1033_v51, %v753_v53 }
 0x2c7   : > { %v745_v58 = vmul.f32 0.5, %v744_v54 }
 0x2c8   : > { %v755_v59 = vmul.f32 0.5, %v754_v55 }
 0x2c9   : > { %v746_v60 = vsub.f32 1.5, %v745_v58 }
 0x2ca   : > { %v756_v61 = vsub.f32 1.5, %v755_v59 }
 0x2cb   : > { %v747_v62 = vmul.f32 %v1031_v50, %v746_v60 }
 0x2cc   : > { %v757_v63 = vmul.f32 %v1033_v51, %v756_v61 }
 0x2cd   : > { %v751_v0 = vsel %vm750_vm10, %v1031_v50, %v747_v62 }
 0x2ce   : > { %v762_v1 = vmul.f32 %v751_v0, %v716_v31  ;;  %v764_v2 = vmul.f32 %v751_v0, %v718_v33  ;;  %v761_v3 = vsel %vm760_vm12, %v1033_v51, %v757_v63  ;;  %v811_v33 = vpop.permute.xlu2 %810 }
 0x2cf   : > { %v763_v4 = vmul.f32 %v761_v3, %v717_v34  ;;  %v765_v5 = vmul.f32 %v761_v3, %v719_v35  ;;  %v813_v34 = vperm.slane %v811_v33, 0  ;;  %v864_v35 = vlaneseq }
 0x2d0   : > { %v778_v6 = vmul.f32 %v774_v56, %v764_v2  ;;  %v776_v7 = vmul.f32 %v769_v57, %v762_v1 }
 0x2d1   : > { %v779_v10 = vmul.f32 %v774_v56, %v765_v5  ;;  %v777_v11 = vmul.f32 %v769_v57, %v763_v4  ;;  %vm866_vm3 = vcmp.lt.s32.totalorder %v864_v35, 256 }
 0x2d2   : > { %v792_v12 = vadd.f32 %v788_v8, %v778_v6  ;;  %v790_v13 = vadd.f32 %v783_v9, %v776_v7 }
 0x2d3   : > { %v793_v14 = vadd.f32 %v788_v8, %v779_v10  ;;  %v791_v15 = vadd.f32 %v783_v9, %v777_v11 }
 0x2d4   : > { %vm796_vm13 = vcmp.gt.f32.partialorder %v792_v12, 0.0  ;;  %v800_v16 = vmul.f32 0.1, %v792_v12  ;;  %v798_v17 = vmul.f32 0.1, %v790_v13  ;;  %vm794_vm15 = vcmp.gt.f32.partialorder %v790_v13, 0.0 }
 0x2d5   : > { %vm797_vm14 = vcmp.gt.f32.partialorder %v793_v14, 0.0  ;;  %v801_v18 = vmul.f32 0.1, %v793_v14  ;;  %v799_v19 = vmul.f32 0.1, %v791_v15  ;;  %vm795_vm0 = vcmp.gt.f32.partialorder %v791_v15, 0.0 }
 0x2d6   : > { %v804_v20 = vsel %vm796_vm13, %v792_v12, %v800_v16  ;;  %v802_v30 = vsel %vm794_vm15, %v790_v13, %v798_v17 }
 0x2d7   : > { %832 = vmatpush.msrb.mxu2 %v804_v20  ;;  %v805_v21 = vsel %vm797_vm14, %v793_v14, %v801_v18  ;;  %v803_v31 = vsel %vm795_vm0, %v791_v15, %v799_v19 }
 0x2d8   : > { %852 = vmatpush.msrb.mxu3 %v805_v21 }
 0x2d9   : > { %833 = vmatpush.msrb.mxu2 %v802_v30 }
 0x2da   : > { %853 = vmatpush.msrb.mxu3 %v803_v31  ;;  %965 = vmatmul.msk.f32.vlgmr.msrb.gmra.mxu2 %vm814_vm1, %v806_v22 }
 0x2db   : > { %966 = vmatmul.msk.f32.vlgmr.msrb.gmra.mxu3 %vm814_vm1, %v806_v22 }
 0x35d   : > { %v835_v36 = vpop.f32.mrf.mxu2 }
 0x35e   : > { %v855_v29 = vpop.f32.mrf.mxu3  ;;  %v836_v38 = vadd.f32 %v835_v36, %v813_v34 }
 0x35f   : > { %v856_v37 = vadd.f32 %v855_v29, %v813_v34 }
 0x361   : > { %v860_v25 = vrot.slane %v856_v37, 7 }
 0x363   : > { %v862_v39 = vsel %vm861_vm2, %v836_v38, %v860_v25 }
 0x364   : > { %868 = vst.msk [vmem:[%s327_s15] sm:$0x3] %vm866_vm3, %v862_v39 }
 0x365   : > { %1061 = shalt.err (!%p1058_p3)
}
 0x366   : > { %972 = dma.vmem_to_hbm [thread:$0]  (%p1193_p5), %s883_s17, 32, %s885_s18, %s870_s8  }
 0x367 PF: > { %p978_p4 = scmp.ge.s32.totalorder %s1096_s14, 2  ;;  %s896_s26 = sand.u32 1, %s1084_s11  }
 0x368   : > { %s897_s30 = scalar_lea.sflag [#allocation4], %s896_s26 }
 0x369   : > { %p975_p7 = pnand %p978_p4, %p1197_p6 }
 0x36b   : > { %p976_p8 = pneg %p975_p7 }
 0x36d   : > { %1079 = dma.done.wait (%p976_p8), %s897_s30, 32  }
 0x36e   : > { %1081 = vsyncadd (%p976_p8), %s897_s30, 4294967264  ;;  %p21_p9 = scmp.ge.s32.totalorder %s1180_s16, 4   ;;  %s1353_s11 = smov %s1088_s12 }
 0x36f   : > { %s1354_s12 = smov %s1092_s13  ;;  %s1355_s13 = smov %s1191_s19 }
 0x370   : > { %s1356_s14 = smov %s1180_s16  ;;  %23 = sbr.rel (!%p21_p9) target bundleno = 6 (0x6), region = 91 }
 0x375   :  { %903 = vsyncpa [#allocation4], 1 }
 0x376   :  { %905 = vsyncpa [#allocation4 + $0x1], 1 }

</bundles_post_ra>
